<compile_context>
chip_gen: v7x
topology: tpu7x:2x2x1
jax: 0.10.0
libtpu: 0.0.40
codegen_flags: <defaults>
</compile_context>

<pallas_src>
import functools

import jax
import jax.numpy as jnp
from jax.experimental import pallas as pl
from jax.experimental.pallas import tpu as pltpu


def _round_up(x, m):
    return ((x + m - 1) // m) * m


def _mlp_kernel(x_ref, w1_ref, b1_ref, w2_ref, b2_ref, w3_ref, b3_ref, o_ref):
    # x_ref:  (IN, TILE_B)  bf16      w1_ref: (L, IN) bf16   b1_ref: (L, 1) f32
    # w2_ref: (L, L) bf16             b2_ref: (L, 1) f32
    # w3_ref: (1, L) bf16             b3_ref: (1, 1) f32
    # o_ref:  (1, TILE_B)   f32
    # Layer 1: Linear(4 -> L) + ReLU   (feature-major: h = W @ x + b)
    h = jnp.dot(w1_ref[...], x_ref[...],
                preferred_element_type=jnp.float32) + b1_ref[...]
    h = jnp.maximum(h, 0.0)
    # Layer 2: Linear(L -> L) + ReLU
    h = jnp.dot(w2_ref[...], h.astype(w2_ref.dtype),
                preferred_element_type=jnp.float32) + b2_ref[...]
    h = jnp.maximum(h, 0.0)
    # Layer 3: Linear(L -> 1) + Sigmoid (exp on EUP + approx reciprocal on EUP,
    # avoids the full-precision VPU divide).
    h = jnp.dot(w3_ref[...], h.astype(w3_ref.dtype),
                preferred_element_type=jnp.float32) + b3_ref[...]
    o_ref[...] = pl.reciprocal(1.0 + jnp.exp(-h), approx=True).astype(o_ref.dtype)


@jax.jit
def linear_relu_forward(x, w1, b1, w2, b2, w3, b3):
    """x: (B, 4) f32.  Weights in PyTorch layout: w (out, in), b (out,)."""
    B, IN = x.shape
    L = w1.shape[0]

    # Batch tile: lane-dense (multiple of 128); large tiles amortize the
    # ~0.35us per-grid-step overhead while staying far under the v7x 32 MiB
    # scoped-VMEM default (a (8, 1024) bf16 x tile is ~16 KiB double-buffered).
    TILE_B = min(1024, _round_up(B, 128))
    B_pad = _round_up(B, TILE_B)
    grid = (B_pad // TILE_B,)

    # Feature-major input: (IN, B_pad), zero-padded batch columns.
    x_t = jnp.zeros((IN, B_pad), jnp.bfloat16)
    x_t = x_t.at[:, :B].set(x.T.astype(jnp.bfloat16))

    w1b = w1.astype(jnp.bfloat16)
    w2b = w2.astype(jnp.bfloat16)
    w3b = w3.astype(jnp.bfloat16)
    b1c = b1.reshape(L, 1).astype(jnp.float32)
    b2c = b2.reshape(L, 1).astype(jnp.float32)
    b3c = b3.reshape(1, 1).astype(jnp.float32)

    const = lambda i: (0, 0)  # weights/biases: same block every grid step
    out = pl.pallas_call(
        _mlp_kernel,
        out_shape=jax.ShapeDtypeStruct((1, B_pad), jnp.float32),
        grid=grid,
        in_specs=[
            pl.BlockSpec((IN, TILE_B), lambda i: (0, i)),   # x (lane-dense)
            pl.BlockSpec((L, IN), const),                    # w1
            pl.BlockSpec((L, 1), const),                     # b1
            pl.BlockSpec((L, L), const),                     # w2
            pl.BlockSpec((L, 1), const),                     # b2
            pl.BlockSpec((1, L), const),                     # w3
            pl.BlockSpec((1, 1), const),                     # b3
        ],
        out_specs=pl.BlockSpec((1, TILE_B), lambda i: (0, i)),
        compiler_params=pltpu.CompilerParams(
            dimension_semantics=("parallel",)),
    )(x_t, w1b, b1c, w2b, b2c, w3b, b3c)

    # Back to PyTorch's (B, 1) row-major output.
    return out[0, :B].reshape(B, 1)


def init_params(key, in_features, hidden, out_features):
    """PyTorch-Linear-style init: U(-1/sqrt(fan_in), 1/sqrt(fan_in)).
    Weights stored in PyTorch (out_features, in_features) layout."""
    def linear_init(k, fan_in, fan_out):
        kw, kb = jax.random.split(k)
        bound = 1.0 / jnp.sqrt(jnp.float32(fan_in))
        w = jax.random.uniform(kw, (fan_out, fan_in), jnp.float32, -bound, bound)
        b = jax.random.uniform(kb, (fan_out,), jnp.float32, -bound, bound)
        return w, b

    k1, k2, k3 = jax.random.split(key, 3)
    w1, b1 = linear_init(k1, in_features, hidden)
    w2, b2 = linear_init(k2, hidden, hidden)
    w3, b3 = linear_init(k3, hidden, out_features)
    return w1, b1, w2, b2, w3, b3


if __name__ == "__main__":
    key = jax.random.PRNGKey(0)
    kx, kp = jax.random.split(key)

    B = 8          # batch (cartpole per-step inference)
    IN = 4         # cartpole observation dim (in_channels=4)
    L = 32         # hidden width `l`
    OUT = 1

    x = jax.random.normal(kx, (B, IN), jnp.float32)
    params = init_params(kp, IN, L, OUT)

    # NOTE: at B=8 the call is pure launch/DMA overhead; the kernel is built to
    # scale to large batches (many envs / timesteps batched into one call).
    out = linear_relu_forward(x, *params)
    out = jax.block_until_ready(out)

    # Reference check in plain JAX f32 (same math, PyTorch layout).
    w1, b1, w2, b2, w3, b3 = params
    h = jnp.maximum(x @ w1.T + b1, 0.0)
    h = jnp.maximum(h @ w2.T + b2, 0.0)
    ref = jax.nn.sigmoid(h @ w3.T + b3)
    assert out.shape == (B, OUT)
    # bf16 matmul inputs + approx reciprocal -> relaxed tolerance vs f32 ref.
    assert jnp.allclose(out, ref, atol=2e-2, rtol=2e-2), (
        f"max abs err {jnp.max(jnp.abs(out - ref))}")

    print("KERNEL_OK")
</pallas_src>

<mosaic_0001>
module attributes {stable_mosaic.version = 11 : i64} {
  func.func @_mlp_kernel(%arg0: i32, %arg1: memref<4x128xbf16, #tpu.memory_space<vmem>>, %arg2: memref<32x4xbf16, #tpu.memory_space<vmem>>, %arg3: memref<32x1xf32, #tpu.memory_space<vmem>>, %arg4: memref<32x32xbf16, #tpu.memory_space<vmem>>, %arg5: memref<32x1xf32, #tpu.memory_space<vmem>>, %arg6: memref<1x32xbf16, #tpu.memory_space<vmem>>, %arg7: memref<1x1xf32, #tpu.memory_space<vmem>>, %arg8: memref<1x128xf32, #tpu.memory_space<vmem>>) attributes {dimension_semantics = [#tpu.dimension_semantics<parallel>], iteration_bounds = array<i64: 1>, scalar_prefetch = 0 : i64, scratch_operands = 0 : i64, tpu.core_type = #tpu.core_type<tc>, window_params = [{transform_indices = @transform_0, window_bounds = array<i64: 4, 128>}, {pipeline_mode = #tpu.pipeline_mode<synchronous>, transform_indices = @transform_1, window_bounds = array<i64: 32, 4>}, {pipeline_mode = #tpu.pipeline_mode<synchronous>, transform_indices = @transform_2, window_bounds = array<i64: 32, 1>}, {pipeline_mode = #tpu.pipeline_mode<synchronous>, transform_indices = @transform_3, window_bounds = array<i64: 32, 32>}, {pipeline_mode = #tpu.pipeline_mode<synchronous>, transform_indices = @transform_4, window_bounds = array<i64: 32, 1>}, {pipeline_mode = #tpu.pipeline_mode<synchronous>, transform_indices = @transform_5, window_bounds = array<i64: 1, 32>}, {pipeline_mode = #tpu.pipeline_mode<synchronous>, transform_indices = @transform_6, window_bounds = array<i64: 1, 1>}, {transform_indices = @transform_7, window_bounds = array<i64: 1, 128>}]} {
    %c0 = arith.constant 0 : index
    %c0_0 = arith.constant 0 : index
    %0 = vector.load %arg2[%c0, %c0_0] : memref<32x4xbf16, #tpu.memory_space<vmem>>, vector<32x4xbf16>
    %c0_1 = arith.constant 0 : index
    %c0_2 = arith.constant 0 : index
    %1 = vector.load %arg1[%c0_1, %c0_2] : memref<4x128xbf16, #tpu.memory_space<vmem>>, vector<4x128xbf16>
    %cst = arith.constant dense<0.000000e+00> : vector<32x128xf32>
    %2 = tpu.matmul %0, %1, %cst {dimension_numbers = #tpu.dot_dimension_numbers<[1], [0], [0], [1], [0, 0, 1, 1], [], []>} : vector<32x4xbf16>, vector<4x128xbf16>, vector<32x128xf32> -> vector<32x128xf32>
    %c0_3 = arith.constant 0 : index
    %c0_4 = arith.constant 0 : index
    %3 = vector.load %arg3[%c0_3, %c0_4] : memref<32x1xf32, #tpu.memory_space<vmem>>, vector<32x1xf32>
    %4 = vector.broadcast %3 : vector<32x1xf32> to vector<32x128xf32>
    %5 = arith.addf %2, %4 : vector<32x128xf32>
    %cst_5 = arith.constant 0.000000e+00 : f32
    %6 = vector.broadcast %cst_5 : f32 to vector<32x128xf32>
    %7 = arith.maximumf %5, %6 : vector<32x128xf32>
    %c0_6 = arith.constant 0 : index
    %c0_7 = arith.constant 0 : index
    %8 = vector.load %arg4[%c0_6, %c0_7] : memref<32x32xbf16, #tpu.memory_space<vmem>>, vector<32x32xbf16>
    %9 = arith.truncf %7 : vector<32x128xf32> to vector<32x128xbf16>
    %cst_8 = arith.constant dense<0.000000e+00> : vector<32x128xf32>
    %10 = tpu.matmul %8, %9, %cst_8 {dimension_numbers = #tpu.dot_dimension_numbers<[1], [0], [0], [1], [0, 0, 1, 1], [], []>} : vector<32x32xbf16>, vector<32x128xbf16>, vector<32x128xf32> -> vector<32x128xf32>
    %c0_9 = arith.constant 0 : index
    %c0_10 = arith.constant 0 : index
    %11 = vector.load %arg5[%c0_9, %c0_10] : memref<32x1xf32, #tpu.memory_space<vmem>>, vector<32x1xf32>
    %12 = vector.broadcast %11 : vector<32x1xf32> to vector<32x128xf32>
    %13 = arith.addf %10, %12 : vector<32x128xf32>
    %cst_11 = arith.constant 0.000000e+00 : f32
    %14 = vector.broadcast %cst_11 : f32 to vector<32x128xf32>
    %15 = arith.maximumf %13, %14 : vector<32x128xf32>
    %c0_12 = arith.constant 0 : index
    %c0_13 = arith.constant 0 : index
    %16 = vector.load %arg6[%c0_12, %c0_13] : memref<1x32xbf16, #tpu.memory_space<vmem>>, vector<1x32xbf16>
    %17 = arith.truncf %15 : vector<32x128xf32> to vector<32x128xbf16>
    %cst_14 = arith.constant dense<0.000000e+00> : vector<1x128xf32>
    %18 = tpu.matmul %16, %17, %cst_14 {dimension_numbers = #tpu.dot_dimension_numbers<[1], [0], [0], [1], [0, 0, 1, 1], [], []>} : vector<1x32xbf16>, vector<32x128xbf16>, vector<1x128xf32> -> vector<1x128xf32>
    %c0_15 = arith.constant 0 : index
    %c0_16 = arith.constant 0 : index
    %19 = vector.load %arg7[%c0_15, %c0_16] : memref<1x1xf32, #tpu.memory_space<vmem>>, vector<1x1xf32>
    %20 = vector.broadcast %19 : vector<1x1xf32> to vector<1x128xf32>
    %21 = arith.addf %18, %20 : vector<1x128xf32>
    %cst_17 = arith.constant 0.000000e+00 : f32
    %22 = vector.broadcast %cst_17 : f32 to vector<1x128xf32>
    %23 = arith.subf %22, %21 : vector<1x128xf32>
    %24 = math.exp %23 : vector<1x128xf32>
    %cst_18 = arith.constant 1.000000e+00 : f32
    %25 = vector.broadcast %cst_18 : f32 to vector<1x128xf32>
    %26 = arith.addf %25, %24 : vector<1x128xf32>
    %27 = tpu.reciprocal %26 {approx = true} : vector<1x128xf32> -> vector<1x128xf32>
    %c0_19 = arith.constant 0 : index
    %c0_20 = arith.constant 0 : index
    %28 = vector.load %arg8[%c0_19, %c0_20] : memref<1x128xf32, #tpu.memory_space<vmem>>, vector<1x128xf32>
    tpu.vector_store %arg8[%c0_19, %c0_20], %27 {strides = array<i32>} : memref<1x128xf32, #tpu.memory_space<vmem>>, vector<1x128xf32>,
    return
  }
  func.func @transform_0(%arg0: i32) -> (i32, i32) {
    %c0_i32 = arith.constant 0 : i32
    %c0_i32_0 = arith.constant 0 : i32
    return %c0_i32, %arg0 : i32, i32
  }
  func.func @transform_1(%arg0: i32) -> (i32, i32) {
    %c0_i32 = arith.constant 0 : i32
    %c0_i32_0 = arith.constant 0 : i32
    %c0_i32_1 = arith.constant 0 : i32
    return %c0_i32, %c0_i32_0 : i32, i32
  }
  func.func @transform_2(%arg0: i32) -> (i32, i32) {
    %c0_i32 = arith.constant 0 : i32
    %c0_i32_0 = arith.constant 0 : i32
    %c0_i32_1 = arith.constant 0 : i32
    return %c0_i32, %c0_i32_0 : i32, i32
  }
  func.func @transform_3(%arg0: i32) -> (i32, i32) {
    %c0_i32 = arith.constant 0 : i32
    %c0_i32_0 = arith.constant 0 : i32
    %c0_i32_1 = arith.constant 0 : i32
    return %c0_i32, %c0_i32_0 : i32, i32
  }
  func.func @transform_4(%arg0: i32) -> (i32, i32) {
    %c0_i32 = arith.constant 0 : i32
    %c0_i32_0 = arith.constant 0 : i32
    %c0_i32_1 = arith.constant 0 : i32
    return %c0_i32, %c0_i32_0 : i32, i32
  }
  func.func @transform_5(%arg0: i32) -> (i32, i32) {
    %c0_i32 = arith.constant 0 : i32
    %c0_i32_0 = arith.constant 0 : i32
    %c0_i32_1 = arith.constant 0 : i32
    return %c0_i32, %c0_i32_0 : i32, i32
  }
  func.func @transform_6(%arg0: i32) -> (i32, i32) {
    %c0_i32 = arith.constant 0 : i32
    %c0_i32_0 = arith.constant 0 : i32
    %c0_i32_1 = arith.constant 0 : i32
    return %c0_i32, %c0_i32_0 : i32, i32
  }
  func.func @transform_7(%arg0: i32) -> (i32, i32) {
    %c0_i32 = arith.constant 0 : i32
    %c0_i32_0 = arith.constant 0 : i32
    return %c0_i32, %arg0 : i32, i32
  }
}

</mosaic_0001>

<bundles_post_ra>
// kernel: linear_relu_forward.1
= control target key start
LH: loop header
LB: loop body
LE: loop exit
PB: predicated region body
PF: predicated region fallthrough
CT: control target
= control target key end

     0   :  { %vm75_vm0 = vcmask 1041408   ;;  %vm68_vm1 = vcmask 31744   ;;  %v353_v1 = vmov 0   ;;  %vm172_vm2 = vcmask 261120   ;;  %s449_s0 = inlined_call_operand.vmem [shape: bf16[4,128], index: 0, kind: input, shape index: {}]   ;;  %s450_s1 = inlined_call_operand.vmem [shape: bf16[32,4], index: 1, kind: input, shape index: {}]   ;;  %s451_s2 = inlined_call_operand.vmem [shape: f32[32,1], index: 2, kind: input, shape index: {}]   ;;  %s452_s6 = inlined_call_operand.<no memory space> [shape: f32[1,1], index: 6, kind: input, shape index: {}]   ;;  %s453_s4 = inlined_call_operand.vmem [shape: f32[32,1], index: 4, kind: input, shape index: {}]   ;;  %s454_s3 = inlined_call_operand.vmem [shape: bf16[32,32], index: 3, kind: input, shape index: {}]   ;;  %s455_s5 = inlined_call_operand.vmem [shape: bf16[1,32], index: 5, kind: input, shape index: {}]   ;;  %s456_s7 = inlined_call_operand.vmem [shape: f32[1,128], index: 7, kind: output, shape index: {}]  }
   0x1   :  { %v33_v0 = vld [vmem:[%s449_s0] sm:$0x3]  ;;  %343 = vset.pattern.permute.xlu0 %v353_v1  ;;  %344 = vset.pattern.permute.xlu1 %v353_v1  ;;  %v12_v2 = vstv %s452_s6  ;;  %v346_v5 = vld [vmem:[%s450_s1 + $0x8] sm:$0xff]   ;;  %v36_v7 = vld [vmem:[%s451_s2 + $0x10] sm:$0xff]  ;;  %v354_v35 = vmov 0.0   ;;  %vm355_vm3 = vmmov 0   ;;  %v241_v55 = vlaneseq }
   0x2   :  { %339 = vmatprep.subr.msk.bf16.mxu0 %vm75_vm0, %v33_v0  ;;  %v77_v3 = vsel %vm75_vm0, %v33_v0, 0  ;;  %v345_v4 = vld [vmem:[%s450_s1] sm:$0xff]   ;;  %13 = vst [vmem:[#allocation2] sm:$0x1] %v12_v2  ;;  %v35_v8 = vld [vmem:[%s451_s2 + $0x8] sm:$0xff]  ;;  %50 = vperm.xlu1 %344, %v36_v7   ;;  %v37_v9 = vld [vmem:[%s451_s2 + $0x18] sm:$0xff] }
   0x3   :  { %318 = vmatpush3.bf16.msra.mxu0 %v77_v3  ;;  %v34_v6 = vld [vmem:[%s451_s2] sm:$0xff]  ;;  %319 = vmatprep.mubr.msk.bf16.mxu0 %vm68_vm1, %v345_v4  ;;  %v139_v11 = vld [vmem:[%s453_s4 + $0x8] sm:$0xff]  ;;  %v140_v12 = vld [vmem:[%s453_s4 + $0x10] sm:$0xff]  ;;  %v242_v56 = vshrl.u32 %v241_v55, 7 }
   0x4   :  { %40 = vperm.xlu0 %343, %v34_v6   ;;  %v138_v10 = vld [vmem:[%s453_s4] sm:$0xff]  ;;  %v141_v13 = vld [vmem:[%s453_s4 + $0x18] sm:$0xff]  ;;  %v348_v34 = vld [vmem:[%s454_s3 + $0x8] sm:$0xff]   ;;  %331 = vmatprep.subr.bf16.mxu0 %v354_v35 }
   0x5   :  { %v347_v15 = vld [vmem:[%s454_s3] sm:$0xff]   ;;  %v243_v57 = vsub.s32 0, %v242_v56 }
   0x6   :  { %320 = vmatmul.mubr.msk.bf16.vlgmr.msra.gmra.mrb[0].mxu0 %vm68_vm1, %v346_v5  ;;  %55 = vperm.xlu1 %344, %v37_v9   ;;  %v232_v54 = vld [vmem:[%s455_s5] sm:$0x1] }
   0x7   :  { %327 = vmatprep.mubr.msk.bf16.mxu1 %vm172_vm2, %v347_v15  ;;  %335 = vmatprep.mubr.msk.bf16.mxu0 %vm355_vm3, %v354_v35 }
   0x8   :  { %45 = vperm.xlu0 %343, %v35_v8  }
   0x9   :  { %v235_v14 = vld [vmem:[#allocation2] sm:$0x1] }
   0xa   :  { %149 = vperm.xlu1 %344, %v139_v11  }
   0xc   :  { %144 = vperm.xlu0 %343, %v138_v10  }
   0xe   :  { %159 = vperm.xlu1 %344, %v141_v13  }
  0x10   :  { %154 = vperm.xlu0 %343, %v140_v12  }
  0x14   :  { %238 = vperm.xlu0 %343, %v235_v14  }
  0x81   :  { %v51_v16 = vpop.permute.xlu1 %50 }
  0x83   :  { %v41_v17 = vpop.permute.xlu0 %40 }
  0x85   :  { %v56_v21 = vpop.permute.xlu1 %55 }
  0x87   :  { %v46_v24 = vpop.permute.xlu0 %45 }
  0x89   :  { %v150_v37 = vpop.permute.xlu1 %149 }
  0x8b   :  { %v145_v36 = vpop.permute.xlu0 %144 }
  0x8d   :  { %v160_v42 = vpop.permute.xlu1 %159 }
  0x8f   :  { %v155_v38 = vpop.permute.xlu0 %154 }
  0x93   :  { %v239_v58 = vpop.permute.xlu0 %238 }
  0x94   :  { %v244_v59 = vrot.slane %v239_v58, %v243_v57 }
  0xd9   :  { %v321_v18 = vpop.f32.mrb[0].mxu0 }
  0xda   :  { %v122_v19 = vadd.f32 %v321_v18, %v51_v16  ;;  %v113_v20 = vpop.f32.mrb[1].mxu0 }
  0xdb   :  { %v114_v22 = vadd.f32 %v113_v20, %v41_v17  ;;  %v322_v23 = vpop.f32.mrb[2].mxu0 }
  0xdc   :  { %v125_v25 = vadd.f32 %v322_v23, %v56_v21  ;;  %v116_v26 = vpop.f32.mrb[3].mxu0  ;;  %v130_v28 = vmax.f32 %v122_v19, 0.0 }
  0xdd   :  { %v117_v27 = vadd.f32 %v116_v26, %v46_v24  ;;  %v128_v30 = vmax.f32 %v114_v22, 0.0 }
  0xde   :  { %v131_v29 = vmax.f32 %v125_v25, 0.0 }
  0xdf   :  { %v129_v31 = vmax.f32 %v117_v27, 0.0 }
  0xe0   :  { %v137_v32 = vpack.c.bf16 %v131_v29, %v130_v28 }
  0xe1   :  { %v136_v33 = vpack.c.bf16 %v129_v31, %v128_v30 }
  0xe3   :  { %323 = vmatprep.subr.bf16.mxu1 %v136_v33 }
  0xe4   :  { %324 = vmatpush3.bf16.msra.mxu1 %v136_v33 }
  0xe5   :  { %325 = vmatprep.subr.bf16.mxu1 %v137_v32 }
  0xe8   :  { %326 = vmatpush3.bf16.msra.mxu1 %v137_v32 }
  0xeb   :  { %328 = vmatmul.mubr.msk.bf16.vlgmr.msra.gmra.mrb[0].mxu1 %vm172_vm2, %v348_v34 }
 0x1be   :  { %v329_v39 = vpop.f32.mrb[0].mxu1 }
 0x1bf   :  { %v222_v40 = vadd.f32 %v329_v39, %v155_v38  ;;  %v213_v41 = vpop.f32.mrb[1].mxu1 }
 0x1c0   :  { %v214_v43 = vadd.f32 %v213_v41, %v145_v36  ;;  %v330_v44 = vpop.f32.mrb[2].mxu1 }
 0x1c1   :  { %v225_v45 = vadd.f32 %v330_v44, %v160_v42  ;;  %v216_v46 = vpop.f32.mrb[3].mxu1  ;;  %v230_v48 = vmax.f32 %v222_v40, 0.0 }
 0x1c2   :  { %v217_v47 = vadd.f32 %v216_v46, %v150_v37  ;;  %v228_v50 = vmax.f32 %v214_v43, 0.0 }
 0x1c3   :  { %v231_v49 = vmax.f32 %v225_v45, 0.0 }
 0x1c4   :  { %v229_v51 = vmax.f32 %v217_v47, 0.0 }
 0x1c5   :  { %v234_v52 = vpack.c.bf16 %v231_v49, %v230_v48 }
 0x1c6   :  { %v233_v53 = vpack.c.bf16 %v229_v51, %v228_v50 }
 0x1c8   :  { %332 = vmatpush3.bf16.msra.mxu0 %v233_v53 }
 0x1c9   :  { %333 = vmatprep.subr.bf16.mxu0 %v354_v35 }
 0x1cc   :  { %334 = vmatpush3.bf16.msra.mxu0 %v234_v52 }
 0x1cf   :  { %336 = vmatmul.mubr.msk.bf16.vlgmr.msra.gmra.mrb[4].mxu0 %vm172_vm2, %v232_v54 }
 0x2a2   :  { %v282_v60 = vpop.f32.mrb[4].mxu0 }
 0x2a3   :  { %v283_v61 = vadd.f32 %v282_v60, %v244_v59  ;;  %v337_v62 = vpop.f32.mrb[5].mxu0 }
 0x2a4   :  { %v285_v63 = vpop.f32.mrb[6].mxu0 }
 0x2a5   :  { %v288_v0 = vsub.f32 0.0, %v283_v61  ;;  %v338_v1 = vpop.f32.mrb[7].mxu0 }
 0x2a7   :  { %v289_v2 = vmul.f32 1.442695, %v288_v0 }
 0x2a9   :  { %349 = vpow2.f32 %v289_v2 }
 0x2b3   :  { %v350_v3 = vpop.eup %349 }
 0x2b4   :  { %v291_v4 = vadd.f32 1.0, %v350_v3 }
 0x2b6   :  { %351 = vrcp.f32 %v291_v4 }
 0x2c0   :  { %v352_v5 = vpop.eup %351 }
 0x2c1   :  { %293 = vst [vmem:[%s456_s7] sm:$0x1] %v352_v5 }

</bundles_post_ra>
